<compile_context>
chip_gen: v6e
topology: v6e:2x2x1
jax: 0.10.0
libtpu: 0.0.40
codegen_flags: <defaults>
</compile_context>

<pallas_src>
import math
from typing import NamedTuple

import jax
import jax.numpy as jnp
from jax.experimental import pallas as pl
from jax.experimental.pallas import tpu as pltpu


# ----------------------------------------------------------------------------
# ArcMarginProduct constants (ArcMarginHead hard-codes s=30.0, m=0.5,
# easy_margin=False).
# ----------------------------------------------------------------------------
S = 30.0
M = 0.5
COS_M = math.cos(M)
SIN_M = math.sin(M)
TH = math.cos(math.pi - M)
MM = math.sin(math.pi - M) * M
EPS = 1e-12  # F.normalize default eps


def _round_up(x, m):
    return (x + m - 1) // m * m


# ----------------------------------------------------------------------------
# Shared epilogue: normalize -> cosine, margin math on the (tm, 1) target
# cosine only, add the correction back at the label column, scale by S.
# ----------------------------------------------------------------------------
def _finalize_tile(acc, invw_ref, invx_ref, label_ref, out_ref, j):
    """acc (tm, tn) f32 = x @ w^T for this tile (un-normalized operands)."""
    cosine = acc * invx_ref[...] * invw_ref[...]                      # (tm, tn)
    tm_, tn_ = cosine.shape
    # One-hot of the label column within this tile (global column index).
    cols = jax.lax.broadcasted_iota(jnp.int32, (tm_, tn_), 1) + j * tn_
    hot = (cols == label_ref[...]).astype(jnp.float32)                # (tm, tn)

    # Margin math only on the per-row target cosine (a (tm, 1) vector).
    tcos = jnp.sum(cosine * hot, axis=-1, keepdims=True)              # (tm, 1)
    sine = jnp.sqrt(jnp.maximum(1.0 - tcos * tcos, 0.0))              # clamp >= 0
    phi = tcos * COS_M - sine * SIN_M
    phi = jnp.where(tcos > TH, phi, tcos - MM)                        # easy_margin=False
    corr = (phi - tcos) * S                                           # (tm, 1)

    # Full-tile epilogue: lane-dense scaled cosine + correction at label col.
    out_ref[...] = (cosine * S + hot * corr).astype(out_ref.dtype)


# ----------------------------------------------------------------------------
# Kernel A: single-K (tk covers the whole feature dim) -> no scratch at all.
# Grid = (B/tm, C/tn).
# ----------------------------------------------------------------------------
def _arc_margin_kernel_single(x_ref, wt_ref, invw_ref, invx_ref, label_ref,
                              out_ref):
    j = pl.program_id(1)  # hoisted: never call program_id inside pl.when
    acc = jnp.dot(x_ref[...], wt_ref[...], preferred_element_type=jnp.float32)
    _finalize_tile(acc, invw_ref, invx_ref, label_ref, out_ref, j)


# ----------------------------------------------------------------------------
# Kernel B: K-tiled accumulation.  Grid = (B/tm, C/tn, F/tk), K innermost.
# ----------------------------------------------------------------------------
def _arc_margin_kernel_acc(x_ref, wt_ref, invw_ref, invx_ref, label_ref,
                           out_ref, acc_ref):
    j = pl.program_id(1)
    k = pl.program_id(2)
    nk = pl.num_programs(2)

    part = jnp.dot(x_ref[...], wt_ref[...], preferred_element_type=jnp.float32)

    @pl.when(k == 0)
    def _():
        acc_ref[...] = part          # assign at k==0: no zero-init + RMW

    @pl.when(k > 0)
    def _():
        acc_ref[...] += part

    @pl.when(k == nk - 1)
    def _():
        _finalize_tile(acc_ref[...], invw_ref, invx_ref, label_ref, out_ref, j)


# ----------------------------------------------------------------------------
# Weight preparation (cacheable across forward calls).
# ----------------------------------------------------------------------------
class ArcWeightPrepared(NamedTuple):
    w_t: jax.Array     # (f_pad, c_pad), matmul dtype, pre-transposed + padded
    inv_w: jax.Array   # (1, c_pad) f32, 1 / max(||w_c||, eps)
    c: int
    f: int
    tn: int
    tk: int


def prepare_arc_margin_weight(weight, *, matmul_dtype=jnp.bfloat16,
                              tn=None, tk=None):
    """weight (C, F) in PyTorch layout -> padded (F, C) + per-class inv norms."""
    c, f = weight.shape
    if tn is None:
        tn = min(1024, _round_up(c, 128))        # lane-dense class dim
    else:
        tn = _round_up(tn, 128)
    if tk is None:
        f_r = _round_up(f, 128)
        tk = f_r if f_r <= 1024 else 512         # full-F when it fits -> nk==1
    else:
        tk = _round_up(tk, 128)

    c_pad = _round_up(c, tn)
    f_pad = _round_up(f, tk)

    w32 = weight.astype(jnp.float32)
    # Transpose once here (parameter prep); the kernel never transposes and the
    # class dim C is the lane-dense output dim.  Padding stays exactly zero.
    w_t = jnp.zeros((f_pad, c_pad), jnp.float32).at[:f, :c].set(w32.T)
    inv_w = jax.lax.rsqrt(
        jnp.maximum(jnp.sum(w_t * w_t, axis=0, keepdims=True), EPS * EPS))
    return ArcWeightPrepared(w_t.astype(matmul_dtype), inv_w, c, f, tn, tk)


# ----------------------------------------------------------------------------
# Main entry point.
# ----------------------------------------------------------------------------
def arc_margin_product(emb, weight, label, *, matmul_dtype=jnp.bfloat16,
                       out_dtype=jnp.float32, tm=None, tn=None, tk=None,
                       prepared=None, vmem_limit_bytes=48 * 1024 * 1024):
    """emb (B, F) float, weight (C, F) float (PyTorch layout), label (B,) int.

    Pass `prepared=prepare_arc_margin_weight(weight, ...)` to reuse the padded
    / transposed / quantized weight across calls.
    """
    if prepared is None:
        prepared = prepare_arc_margin_weight(weight, matmul_dtype=matmul_dtype,
                                             tn=tn, tk=tk)
    b, f = emb.shape
    assert f == prepared.f, (f, prepared.f)
    c = prepared.c
    f_pad, c_pad = prepared.w_t.shape
    tn_eff, tk_eff = prepared.tn, prepared.tk
    x_dtype = prepared.w_t.dtype

    # tm: cover the whole (padded) batch when possible so the weight streams
    # from HBM once; respect bf16 sublane packing (16) vs f32 (8).
    sub = 16 if x_dtype == jnp.bfloat16 else 8
    tm = min(512, _round_up(b, sub)) if tm is None else _round_up(tm, sub)
    b_pad = _round_up(b, tm)

    # v7x: keep >= 2 blocks along a parallel grid axis so both TensorCores work.
    if tn is None and (b_pad // tm) * (c_pad // tn_eff) < 2 and c_pad % 256 == 0:
        tn_eff = c_pad // 2

    # Row 1/||x|| from the f32 embedding -- hoisted out of the kernel.
    emb32 = emb.astype(jnp.float32)
    inv_x = jax.lax.rsqrt(
        jnp.maximum(jnp.sum(emb32 * emb32, axis=1, keepdims=True), EPS * EPS))
    inv_x_p = jnp.ones((b_pad, 1), jnp.float32).at[:b, :].set(inv_x)
    # Embedding cast ONCE here (bf16 by default) -- no per-tile cast in-kernel.
    emb_p = jnp.zeros((b_pad, f_pad), x_dtype).at[:b, :f].set(emb.astype(x_dtype))
    lab = jnp.full((b_pad, 1), -1, jnp.int32).at[:b, 0].set(label.astype(jnp.int32))
    # TODO(synk): labels could live in SMEM via scalar prefetch; kept as a tiny
    # (tm, 1) VMEM block for lowering robustness.

    nk = f_pad // tk_eff
    cparams = pltpu.CompilerParams(
        dimension_semantics=(("parallel", "parallel") if nk == 1
                             else ("parallel", "parallel", "arbitrary")),
        vmem_limit_bytes=vmem_limit_bytes)

    if nk == 1:
        grid = (b_pad // tm, c_pad // tn_eff)
        out = pl.pallas_call(
            _arc_margin_kernel_single,
            out_shape=jax.ShapeDtypeStruct((b_pad, c_pad), out_dtype),
            grid_spec=pltpu.PrefetchScalarGridSpec(
                num_scalar_prefetch=0, grid=grid,
                in_specs=[
                    pl.BlockSpec((tm, f_pad), lambda i, j: (i, 0)),      # emb
                    pl.BlockSpec((f_pad, tn_eff), lambda i, j: (0, j)),  # w^T
                    pl.BlockSpec((1, tn_eff), lambda i, j: (0, j)),      # 1/||w||
                    pl.BlockSpec((tm, 1), lambda i, j: (i, 0)),          # 1/||x||
                    pl.BlockSpec((tm, 1), lambda i, j: (i, 0)),          # labels
                ],
                out_specs=pl.BlockSpec((tm, tn_eff), lambda i, j: (i, j)),
            ),
            compiler_params=cparams,
        )(emb_p, prepared.w_t, prepared.inv_w, inv_x_p, lab)
    else:
        grid = (b_pad // tm, c_pad // tn_eff, nk)
        out = pl.pallas_call(
            _arc_margin_kernel_acc,
            out_shape=jax.ShapeDtypeStruct((b_pad, c_pad), out_dtype),
            grid_spec=pltpu.PrefetchScalarGridSpec(
                num_scalar_prefetch=0, grid=grid,
                in_specs=[
                    pl.BlockSpec((tm, tk_eff), lambda i, j, k: (i, k)),     # emb
                    pl.BlockSpec((tk_eff, tn_eff), lambda i, j, k: (k, j)), # w^T
                    pl.BlockSpec((1, tn_eff), lambda i, j, k: (0, j)),      # 1/||w||
                    pl.BlockSpec((tm, 1), lambda i, j, k: (i, 0)),          # 1/||x||
                    pl.BlockSpec((tm, 1), lambda i, j, k: (i, 0)),          # labels
                ],
                out_specs=pl.BlockSpec((tm, tn_eff), lambda i, j, k: (i, j)),
                scratch_shapes=[pltpu.VMEM((tm, tn_eff), jnp.float32)],
            ),
            compiler_params=cparams,
        )(emb_p, prepared.w_t, prepared.inv_w, inv_x_p, lab)

    return out[:b, :c]


# ----------------------------------------------------------------------------
# Deterministic parameter init + placeholder backbone (plain-JAX glue).
# ----------------------------------------------------------------------------
def xavier_uniform(key, shape):
    fan_out, fan_in = shape
    limit = math.sqrt(6.0 / (fan_in + fan_out))
    return jax.random.uniform(key, shape, jnp.float32, -limit, limit)


def placeholder_backbone(x, proj):
    # TODO(synk): stand-in for EEG_Net_8_Stack (definition / checkpoint absent).
    b = x.shape[0]
    return x.reshape(b, -1) @ proj


def arc_margin_head_forward(x, label, proj, arc_weight, *,
                            matmul_dtype=jnp.bfloat16):
    emb = placeholder_backbone(x, proj)          # (B, in_features)
    return arc_margin_product(emb, arc_weight, label, matmul_dtype=matmul_dtype)


# ----------------------------------------------------------------------------
# Pure-JAX reference (mirrors the PyTorch math; 1-cos^2 clamped like the kernel).
# ----------------------------------------------------------------------------
def arc_margin_reference(emb, weight, label):
    xn = emb / jnp.maximum(jnp.linalg.norm(emb, axis=1, keepdims=True), EPS)
    wn = weight / jnp.maximum(jnp.linalg.norm(weight, axis=1, keepdims=True), EPS)
    cosine = xn @ wn.T
    sine = jnp.sqrt(jnp.maximum(1.0 - cosine ** 2, 0.0))
    phi = cosine * COS_M - sine * SIN_M
    phi = jnp.where(cosine > TH, phi, cosine - MM)
    one_hot = jax.nn.one_hot(label, weight.shape[0], dtype=jnp.float32)
    return (one_hot * phi + (1.0 - one_hot) * cosine) * S


if __name__ == "__main__":
    key = jax.random.PRNGKey(0)
    k_x, k_w, k_p, k_l, k_e2, k_w2, k_l2 = jax.random.split(key, 7)

    # ---- Test 1: full head forward at module-consistent toy shapes ----------
    batch = 8
    in_features = 32        # embedding dim produced by the backbone
    out_features = 16       # number of classes
    x = jax.random.normal(k_x, (batch, 1, 8, 64), dtype=jnp.float32)
    label = jax.random.randint(k_l, (batch,), 0, out_features, dtype=jnp.int32)
    arc_weight = xavier_uniform(k_w, (out_features, in_features))
    proj = jax.random.normal(k_p, (1 * 8 * 64, in_features), jnp.float32) * 0.05

    fwd = jax.jit(arc_margin_head_forward)
    out = jax.block_until_ready(fwd(x, label, proj, arc_weight))

    emb = placeholder_backbone(x, proj)
    ref = arc_margin_reference(emb, arc_weight, label)
    assert out.shape == (batch, out_features)
    # Default path uses bf16 matmul operands -> loose tolerance.
    assert jnp.allclose(out, ref, atol=0.5, rtol=0.05), (
        f"max abs err {jnp.max(jnp.abs(out - ref))}")

    # f32 matmul path, tight tolerance.
    out_f32 = jax.block_until_ready(
        arc_margin_product(emb, arc_weight, label, matmul_dtype=jnp.float32))
    assert jnp.allclose(out_f32, ref, atol=2e-3, rtol=2e-3), (
        f"max abs err {jnp.max(jnp.abs(out_f32 - ref))}")

    # ---- Test 2: multi-tile grid (B/C/K tiling, accumulation, padded C) -----
    b2, f2_, c2 = 16, 256, 200
    emb2 = jax.random.normal(k_e2, (b2, f2_), jnp.float32)
    w2 = xavier_uniform(k_w2, (c2, f2_))
    lab2 = jax.random.randint(k_l2, (b2,), 0, c2, dtype=jnp.int32)
    ref2 = arc_margin_reference(emb2, w2, lab2)

    out2 = jax.block_until_ready(
        arc_margin_product(emb2, w2, lab2, matmul_dtype=jnp.float32,
                           tm=8, tn=128, tk=128))
    assert jnp.allclose(out2, ref2, atol=2e-3, rtol=2e-3), (
        f"max abs err {jnp.max(jnp.abs(out2 - ref2))}")

    # Cached / prepared-weight path (bf16 default) -> looser tolerance.
    prep = prepare_arc_margin_weight(w2, tn=128, tk=128)
    out2b = jax.block_until_ready(
        arc_margin_product(emb2, None, lab2, prepared=prep))
    assert jnp.allclose(out2b, ref2, atol=0.5, rtol=0.05), (
        f"max abs err {jnp.max(jnp.abs(out2b - ref2))}")

    print("KERNEL_OK")
</pallas_src>

<mosaic_0001>
module attributes {stable_mosaic.version = 11 : i64} {
  func.func @_arc_margin_kernel_single(%arg0: i32, %arg1: i32, %arg2: memref<16x128xbf16, #tpu.memory_space<vmem>>, %arg3: memref<128x128xbf16, #tpu.memory_space<vmem>>, %arg4: memref<1x128xf32, #tpu.memory_space<vmem>>, %arg5: memref<16x1xf32, #tpu.memory_space<vmem>>, %arg6: memref<16x1xi32, #tpu.memory_space<vmem>>, %arg7: memref<16x128xf32, #tpu.memory_space<vmem>>) attributes {dimension_semantics = [#tpu.dimension_semantics<parallel>, #tpu.dimension_semantics<parallel>], iteration_bounds = array<i64: 1, 1>, scalar_prefetch = 0 : i64, scratch_operands = 0 : i64, tpu.core_type = #tpu.core_type<tc>, window_params = [{transform_indices = @transform_0, window_bounds = array<i64: 16, 128>}, {transform_indices = @transform_1, window_bounds = array<i64: 128, 128>}, {transform_indices = @transform_2, window_bounds = array<i64: 1, 128>}, {transform_indices = @transform_3, window_bounds = array<i64: 16, 1>}, {transform_indices = @transform_4, window_bounds = array<i64: 16, 1>}, {transform_indices = @transform_5, window_bounds = array<i64: 16, 128>}]} {
    %c0 = arith.constant 0 : index
    %c0_0 = arith.constant 0 : index
    %0 = vector.load %arg2[%c0, %c0_0] : memref<16x128xbf16, #tpu.memory_space<vmem>>, vector<16x128xbf16>
    %c0_1 = arith.constant 0 : index
    %c0_2 = arith.constant 0 : index
    %1 = vector.load %arg3[%c0_1, %c0_2] : memref<128x128xbf16, #tpu.memory_space<vmem>>, vector<128x128xbf16>
    %cst = arith.constant dense<0.000000e+00> : vector<16x128xf32>
    %2 = tpu.matmul %0, %1, %cst {dimension_numbers = #tpu.dot_dimension_numbers<[1], [0], [0], [1], [0, 0, 1, 1], [], []>} : vector<16x128xbf16>, vector<128x128xbf16>, vector<16x128xf32> -> vector<16x128xf32>
    %c0_3 = arith.constant 0 : index
    %c0_4 = arith.constant 0 : index
    %3 = vector.load %arg5[%c0_3, %c0_4] : memref<16x1xf32, #tpu.memory_space<vmem>>, vector<16x1xf32>
    %4 = vector.broadcast %3 : vector<16x1xf32> to vector<16x128xf32>
    %5 = arith.mulf %2, %4 : vector<16x128xf32>
    %c0_5 = arith.constant 0 : index
    %c0_6 = arith.constant 0 : index
    %6 = vector.load %arg4[%c0_5, %c0_6] : memref<1x128xf32, #tpu.memory_space<vmem>>, vector<1x128xf32>
    %7 = vector.broadcast %6 : vector<1x128xf32> to vector<16x128xf32>
    %8 = arith.mulf %5, %7 : vector<16x128xf32>
    %9 = tpu.iota {dimensions = array<i32: 1>} : vector<16x128xi32>
    %c128_i32 = arith.constant 128 : i32
    %10 = arith.muli %arg1, %c128_i32 : i32
    %11 = vector.broadcast %10 : i32 to vector<16x128xi32>
    %12 = arith.addi %9, %11 : vector<16x128xi32>
    %c0_7 = arith.constant 0 : index
    %c0_8 = arith.constant 0 : index
    %13 = vector.load %arg6[%c0_7, %c0_8] : memref<16x1xi32, #tpu.memory_space<vmem>>, vector<16x1xi32>
    %14 = vector.broadcast %13 : vector<16x1xi32> to vector<16x128xi32>
    %15 = arith.cmpi eq, %12, %14 : vector<16x128xi32>
    %16 = arith.extui %15 : vector<16x128xi1> to vector<16x128xi32>
    %17 = arith.sitofp %16 : vector<16x128xi32> to vector<16x128xf32>
    %18 = arith.mulf %8, %17 : vector<16x128xf32>
    %cst_9 = arith.constant dense<0.000000e+00> : vector<16xf32>
    %19 = vector.multi_reduction <add>, %18, %cst_9 [1] : vector<16x128xf32> to vector<16xf32>
    %20 = vector.shape_cast %19 : vector<16xf32> to vector<16x1xf32>
    %21 = arith.mulf %20, %20 : vector<16x1xf32>
    %cst_10 = arith.constant 1.000000e+00 : f32
    %22 = vector.broadcast %cst_10 : f32 to vector<16x1xf32>
    %23 = arith.subf %22, %21 : vector<16x1xf32>
    %cst_11 = arith.constant 0.000000e+00 : f32
    %24 = vector.broadcast %cst_11 : f32 to vector<16x1xf32>
    %25 = arith.maximumf %23, %24 : vector<16x1xf32>
    %26 = math.sqrt %25 : vector<16x1xf32>
    %cst_12 = arith.constant 0.87758255 : f32
    %27 = vector.broadcast %cst_12 : f32 to vector<16x1xf32>
    %28 = arith.mulf %20, %27 : vector<16x1xf32>
    %cst_13 = arith.constant 0.47942555 : f32
    %29 = vector.broadcast %cst_13 : f32 to vector<16x1xf32>
    %30 = arith.mulf %26, %29 : vector<16x1xf32>
    %31 = arith.subf %28, %30 : vector<16x1xf32>
    %cst_14 = arith.constant -0.87758255 : f32
    %32 = vector.broadcast %cst_14 : f32 to vector<16x1xf32>
    %33 = arith.cmpf ogt, %20, %32 : vector<16x1xf32>
    %cst_15 = arith.constant 0.239712775 : f32
    %34 = vector.broadcast %cst_15 : f32 to vector<16x1xf32>
    %35 = arith.subf %20, %34 : vector<16x1xf32>
    %36 = arith.select %33, %31, %35 : vector<16x1xi1>, vector<16x1xf32>
    %37 = arith.subf %36, %20 : vector<16x1xf32>
    %cst_16 = arith.constant 3.000000e+01 : f32
    %38 = vector.broadcast %cst_16 : f32 to vector<16x1xf32>
    %39 = arith.mulf %37, %38 : vector<16x1xf32>
    %cst_17 = arith.constant 3.000000e+01 : f32
    %40 = vector.broadcast %cst_17 : f32 to vector<16x128xf32>
    %41 = arith.mulf %8, %40 : vector<16x128xf32>
    %42 = vector.broadcast %39 : vector<16x1xf32> to vector<16x128xf32>
    %43 = arith.mulf %17, %42 : vector<16x128xf32>
    %44 = arith.addf %41, %43 : vector<16x128xf32>
    %c0_18 = arith.constant 0 : index
    %c0_19 = arith.constant 0 : index
    %45 = vector.load %arg7[%c0_18, %c0_19] : memref<16x128xf32, #tpu.memory_space<vmem>>, vector<16x128xf32>
    tpu.vector_store %arg7[%c0_18, %c0_19], %44 {strides = array<i32>} : memref<16x128xf32, #tpu.memory_space<vmem>>, vector<16x128xf32>,
    return
  }
  func.func @transform_0(%arg0: i32, %arg1: i32) -> (i32, i32) {
    %c0_i32 = arith.constant 0 : i32
    %c0_i32_0 = arith.constant 0 : i32
    return %arg0, %c0_i32 : i32, i32
  }
  func.func @transform_1(%arg0: i32, %arg1: i32) -> (i32, i32) {
    %c0_i32 = arith.constant 0 : i32
    %c0_i32_0 = arith.constant 0 : i32
    return %c0_i32, %arg1 : i32, i32
  }
  func.func @transform_2(%arg0: i32, %arg1: i32) -> (i32, i32) {
    %c0_i32 = arith.constant 0 : i32
    %c0_i32_0 = arith.constant 0 : i32
    return %c0_i32, %arg1 : i32, i32
  }
  func.func @transform_3(%arg0: i32, %arg1: i32) -> (i32, i32) {
    %c0_i32 = arith.constant 0 : i32
    %c0_i32_0 = arith.constant 0 : i32
    return %arg0, %c0_i32 : i32, i32
  }
  func.func @transform_4(%arg0: i32, %arg1: i32) -> (i32, i32) {
    %c0_i32 = arith.constant 0 : i32
    %c0_i32_0 = arith.constant 0 : i32
    return %arg0, %c0_i32 : i32, i32
  }
  func.func @transform_5(%arg0: i32, %arg1: i32) -> (i32, i32) {
    %c0_i32 = arith.constant 0 : i32
    return %arg0, %arg1 : i32, i32
  }
}

</mosaic_0001>

<bundles_post_ra>
// kernel: arc_margin_head_forward.1
= control target key start
LH: loop header
LB: loop body
LE: loop exit
PB: predicated region body
PF: predicated region fallthrough
CT: control target
= control target key end

     0   :  { %v291_v0 = vmov 0.0   ;;  %vm292_vm0 = vmmov 0   ;;  %v293_v2 = vmov 0   ;;  %v157_v15 = vlaneseq  ;;  %s383_s1 = inlined_call_operand.vmem [shape: bf16[128,128], index: 1, kind: input, shape index: {}]   ;;  %s384_s3 = inlined_call_operand.vmem [shape: f32[16,1], index: 3, kind: input, shape index: {}]   ;;  %s385_s4 = inlined_call_operand.vmem [shape: s32[16,1], index: 4, kind: input, shape index: {}]   ;;  %s386_s0 = inlined_call_operand.vmem [shape: bf16[16,128], index: 0, kind: input, shape index: {}]   ;;  %s387_s2 = inlined_call_operand.vmem [shape: f32[1,128], index: 2, kind: input, shape index: {}]   ;;  %s388_s5 = inlined_call_operand.vmem [shape: f32[16,128], index: 5, kind: output, shape index: {}]  }
   0x1   :  { %253 = vmatprep.subr.bf16.mxu0 %v291_v0  ;;  %v278_v1 = vld [vmem:[%s383_s1 + $0x38] sm:$0xff]   ;;  %269 = vmatprep.mubr.msk.bf16.mxu0 %vm292_vm0, %v291_v0  ;;  %v279_v3 = vld [vmem:[%s383_s1 + $0x30] sm:$0xff]   ;;  %v280_v4 = vld [vmem:[%s383_s1 + $0x28] sm:$0xff]  }
   0x2   :  { %276 = vset.pattern.permute.xlu0 %v293_v2  ;;  %277 = vset.pattern.permute.xlu1 %v293_v2  ;;  %v134_v5 = vld [vmem:[%s384_s3] sm:$0xff]  ;;  %v135_v8 = vld [vmem:[%s384_s3 + $0x8] sm:$0xff]  ;;  %v282_v10 = vld [vmem:[%s383_s1 + $0x18] sm:$0xff]   ;;  %v158_v16 = vand.u32 127, %v157_v15 }
   0x3   :  { %254 = vmatpush3.bf16.msra.mxu0 %v278_v1  ;;  %v162_v6 = vld [vmem:[%s385_s4] sm:$0xff]  ;;  %138 = vperm.xlu0 %276, %v134_v5   ;;  %v163_v9 = vld [vmem:[%s385_s4 + $0x8] sm:$0xff]  ;;  %v283_v11 = vld [vmem:[%s383_s1 + $0x10] sm:$0xff]  }
   0x4   :  { %255 = vmatprep.subr.bf16.mxu0 %v291_v0  ;;  %v281_v7 = vld [vmem:[%s383_s1 + $0x20] sm:$0xff]   ;;  %165 = vperm.xlu1 %277, %v162_v6   ;;  %v284_v12 = vld [vmem:[%s383_s1 + $0x8] sm:$0xff]  }
   0x5   :  { %v285_v13 = vld [vmem:[%s383_s1] sm:$0xff]  }
   0x6   :  { %v286_v14 = vld [vmem:[%s386_s0] sm:$0xff]  }
   0x7   :  { %256 = vmatpush3.bf16.msra.mxu0 %v279_v3  ;;  %143 = vperm.xlu0 %276, %v135_v8   ;;  %v239_v20 = vld [vmem:[%s387_s2] ss:$0 sm:$0xff] }
   0x8   :  { %257 = vmatprep.subr.bf16.mxu0 %v291_v0  ;;  %168 = vperm.xlu1 %277, %v163_v9  }
   0xb   :  { %258 = vmatpush3.bf16.msra.mxu0 %v280_v4 }
   0xc   :  { %259 = vmatprep.subr.bf16.mxu0 %v291_v0 }
   0xf   :  { %260 = vmatpush3.bf16.msra.mxu0 %v281_v7 }
  0x10   :  { %261 = vmatprep.subr.bf16.mxu0 %v291_v0 }
  0x13   :  { %262 = vmatpush3.bf16.msra.mxu0 %v282_v10 }
  0x14   :  { %263 = vmatprep.subr.bf16.mxu0 %v291_v0 }
  0x17   :  { %264 = vmatpush3.bf16.msra.mxu0 %v283_v11 }
  0x18   :  { %265 = vmatprep.subr.bf16.mxu0 %v291_v0 }
  0x1b   :  { %266 = vmatpush3.bf16.msra.mxu0 %v284_v12 }
  0x1c   :  { %267 = vmatprep.subr.bf16.mxu0 %v291_v0 }
  0x1f   :  { %268 = vmatpush3.bf16.msra.mxu0 %v285_v13 }
  0x22   :  { %270 = vmatmul.mubr.bf16.vlgmr.msra.gmra.mxu0 %v286_v14 }
  0x7e   :  { %v139_v18 = vpop.permute.xlu0 %138 }
  0x7f   :  { %v166_v17 = vpop.permute.xlu1 %165 }
  0x80   :  { %vm170_vm1 = vcmp.eq.s32.totalorder %v158_v16, %v166_v17 }
  0x81   :  { %v240_v22 = vsel %vm170_vm1, 1.0, %v291_v0 }
  0x82   :  { %v144_v26 = vpop.permute.xlu0 %143 }
  0x83   :  { %v169_v23 = vpop.permute.xlu1 %168 }
  0x84   :  { %vm171_vm2 = vcmp.eq.s32.totalorder %v158_v16, %v169_v23 }
  0x85   :  { %v241_v32 = vsel %vm171_vm2, 1.0, %v291_v0 }
  0xe2   :  { %v127_v19 = vpop.f32.mrf.mxu0 }
  0xe3   :  { %v146_v21 = vmul.f32 %v139_v18, %v127_v19 }
  0xe4   :  { %v271_v24 = vpop.f32.mrf.mxu0 }
  0xe5   :  { %v155_v25 = vmul.f32 %v239_v20, %v146_v21 }
  0xe6   :  { %v130_v27 = vpop.f32.mrf.mxu0 }
  0xe7   :  { %v147_v28 = vmul.f32 %v144_v26, %v130_v27  ;;  %v176_v29 = vmul.f32 %v240_v22, %v155_v25  ;;  %v218_v63 = vmul.f32 30.0, %v155_v25 }
  0xe8   :  { %v272_v30 = vpop.f32.mrf.mxu0 }
  0xe9   :  { %v156_v31 = vmul.f32 %v239_v20, %v147_v28  ;;  %178 = vadd.xlane.f32.xlu0 %v176_v29 }
  0xeb   :  { %v177_v33 = vmul.f32 %v241_v32, %v156_v31  ;;  %v219_v5 = vmul.f32 30.0, %v156_v31 }
  0xed   :  { %180 = vadd.xlane.f32.xlu1 %v177_v33 }
 0x172   :  { %v179_v34 = vpop.xlane.xlu0 %178 }
 0x173   :  { %v182_v35 = vmul.f32 %v179_v34, %v179_v34  ;;  %v202_v48 = vmul.f32 0.87758255, %v179_v34  ;;  %v242_v52 = vadd.f32 -0.23971277, %v179_v34  ;;  %vm208_vm6 = vcmp.gt.f32.partialorder %v179_v34, -0.87758255 }
 0x175   :  { %v184_v36 = vsub.f32 1.0, %v182_v35 }
 0x176   :  { %v181_v37 = vpop.xlane.xlu1 %180 }
 0x177   :  { %v186_v38 = vmax.f32 %v184_v36, 0.0  ;;  %v183_v39 = vmul.f32 %v181_v37, %v181_v37  ;;  %v203_v58 = vmul.f32 0.87758255, %v181_v37  ;;  %v243_v62 = vadd.f32 -0.23971277, %v181_v37 }
 0x178   :  { %vm209_vm8 = vcmp.gt.f32.partialorder %v181_v37, -0.87758255 }
 0x179   :  { %287 = vrsqrt.f32 %v186_v38  ;;  %v185_v40 = vsub.f32 1.0, %v183_v39  ;;  %vm190_vm3 = vcmp.eq.f32.partialorder %v186_v38, inf  ;;  %v193_v44 = vand.u32 2147483648, %v186_v38 }
 0x17a   :  { %vm192_vm4 = vcmp.eq.f32.partialorder %v186_v38, 0.0 }
 0x17b   :  { %v187_v41 = vmax.f32 %v185_v40, 0.0 }
 0x17d   :  { %289 = vrsqrt.f32 %v187_v41  ;;  %vm197_vm5 = vcmp.eq.f32.partialorder %v187_v41, inf  ;;  %v200_v53 = vand.u32 2147483648, %v187_v41  ;;  %vm199_vm7 = vcmp.eq.f32.partialorder %v187_v41, 0.0 }
 0x186   :  { %v288_v42 = vpop.eup %287 }
 0x187   :  { %v189_v43 = vmul.f32 %v288_v42, %v186_v38 }
 0x189   :  { %v191_v45 = vsel %vm190_vm3, %v186_v38, %v189_v43 }
 0x18a   :  { %v194_v46 = vsel %vm192_vm4, %v193_v44, %v191_v45  ;;  %v290_v47 = vpop.eup %289 }
 0x18b   :  { %v204_v49 = vmul.f32 0.47942555, %v194_v46  ;;  %v196_v50 = vmul.f32 %v290_v47, %v187_v41 }
 0x18d   :  { %v206_v51 = vsub.f32 %v202_v48, %v204_v49  ;;  %v198_v54 = vsel %vm197_vm5, %v187_v41, %v196_v50 }
 0x18e   :  { %v201_v56 = vsel %vm199_vm7, %v200_v53, %v198_v54 }
 0x18f   :  { %v212_v55 = vsel %vm208_vm6, %v206_v51, %v242_v52  ;;  %v205_v59 = vmul.f32 0.47942555, %v201_v56 }
 0x190   :  { %v214_v57 = vsub.f32 %v212_v55, %v179_v34 }
 0x191   :  { %v207_v61 = vsub.f32 %v203_v58, %v205_v59 }
 0x192   :  { %v216_v60 = vmul.f32 30.0, %v214_v57 }
 0x193   :  { %v213_v1 = vsel %vm209_vm8, %v207_v61, %v243_v62 }
 0x194   :  { %v220_v0 = vmul.f32 %v240_v22, %v216_v60  ;;  %v215_v2 = vsub.f32 %v213_v1, %v181_v37 }
 0x196   :  { %v222_v3 = vadd.f32 %v220_v0, %v218_v63  ;;  %v217_v4 = vmul.f32 30.0, %v215_v2 }
 0x198   :  { %224 = vst [vmem:[%s388_s5] sm:$0xff] %v222_v3  ;;  %v221_v6 = vmul.f32 %v241_v32, %v217_v4 }
 0x19a   :  { %v223_v7 = vadd.f32 %v221_v6, %v219_v5 }
 0x19c   :  { %225 = vst [vmem:[%s388_s5 + $0x8] sm:$0xff] %v223_v7 }

</bundles_post_ra>
